<compile_context>
chip_gen: v5e
topology: v5e:2x2
jax: 0.10.0
libtpu: 0.0.40
codegen_flags: <defaults>
</compile_context>

<pallas_src>
import jax
import jax.numpy as jnp
from jax.experimental import pallas as pl
from jax.experimental.pallas import tpu as pltpu


def _round_up(n, m):
    return (n + m - 1) // m * m


def mlp_kernel(x_ref, w1_ref, b1_ref, w2_ref, b2_ref, w3_ref, b3_ref, o_ref):
    # Shapes (feature-major, batch on lanes):
    #   x_ref: (4, TB)   w1: (10, 4)  b1: (10, 1)
    #                    w2: (10, 10) b2: (10, 1)
    #                    w3: (3, 10)  b3: (3, 1)
    #   o_ref: (3, TB)
    x = x_ref[...]

    # Contractions are tiny (K = 4/10, N = 10/3); jnp.dot keeps them on the
    # MXU, which is otherwise idle (the kernel is HBM-bound on x / out), while
    # the lane axis (batch) stays full-width for every VPU op and the store.
    h1 = jnp.dot(w1_ref[...], x, preferred_element_type=jnp.float32) + b1_ref[...]
    h1 = jnp.maximum(h1, 0.0)

    h2 = jnp.dot(w2_ref[...], h1, preferred_element_type=jnp.float32) + b2_ref[...]
    h2 = jnp.maximum(h2, 0.0)

    out = jnp.dot(w3_ref[...], h2, preferred_element_type=jnp.float32) + b3_ref[...]
    o_ref[...] = out.astype(o_ref.dtype)


def mlp_forward(x, params, *, block_b=None):
    """x: (B, 4) float32; params: kernel-ready dict (see init_params).

    Returns (B, 3) float32, matching the PyTorch module's convention.
    """
    w1, b1 = params["w1"], params["b1"]
    w2, b2 = params["w2"], params["b2"]
    w3, b3 = params["w3"], params["b3"]

    B = x.shape[0]
    if block_b is None:
        # Lane-aligned batch tile.  Large tiles amortize the ~0.35 us per-step
        # overhead; per-block VMEM stays tiny on every TPU generation.
        block_b = min(2048, _round_up(B, 128))
    B_pad = _round_up(B, block_b)

    # Feature-major: put batch on the lane axis; pad batch to a full tile.
    x_t = jnp.transpose(x)                                   # (4, B)
    if B_pad != B:
        x_t = jnp.pad(x_t, ((0, 0), (0, B_pad - B)))         # (4, B_pad)

    grid = (B_pad // block_b,)

    def batch_spec(shape):
        return pl.BlockSpec(shape, lambda i: (0, i))

    def whole_spec(shape):
        return pl.BlockSpec(shape, lambda i: (0, 0))

    flops = 2 * B_pad * (4 * 10 + 10 * 10 + 10 * 3)
    param_bytes = 4 * (10 * 4 + 10 + 10 * 10 + 10 + 3 * 10 + 3)
    bytes_accessed = 4 * B_pad * (4 + 3) + param_bytes

    out_t = pl.pallas_call(
        mlp_kernel,
        out_shape=jax.ShapeDtypeStruct((3, B_pad), jnp.float32),
        grid=grid,
        in_specs=[
            batch_spec((4, block_b)),        # x tile, pipelined over batch
            whole_spec((10, 4)),  whole_spec((10, 1)),
            whole_spec((10, 10)), whole_spec((10, 1)),
            whole_spec((3, 10)),  whole_spec((3, 1)),
        ],
        out_specs=batch_spec((3, block_b)),
        compiler_params=pltpu.CompilerParams(
            dimension_semantics=("parallel",)),
        cost_estimate=pl.CostEstimate(
            flops=flops, transcendentals=0, bytes_accessed=bytes_accessed),
    )(x_t, w1, b1, w2, b2, w3, b3)

    # Back to PyTorch's (B, 3) convention; drop batch padding.
    return jnp.transpose(out_t[:, :B])


def init_params(key):
    """Kernel-ready parameters with deterministic nn.Linear-style init.

    Weights keep PyTorch's (out_features, in_features) layout (no transposes
    needed for the feature-major kernel); biases are stored once as (out, 1)
    columns so the per-call wrapper does zero reshapes.
    """
    def linear(k, fan_in, fan_out):
        kw, kb = jax.random.split(k)
        bound = 1.0 / jnp.sqrt(jnp.float32(fan_in))
        w = jax.random.uniform(kw, (fan_out, fan_in), jnp.float32, -bound, bound)
        b = jax.random.uniform(kb, (fan_out, 1), jnp.float32, -bound, bound)
        return w, b

    k1, k2, k3 = jax.random.split(key, 3)
    w1, b1 = linear(k1, 4, 10)
    w2, b2 = linear(k2, 10, 10)
    w3, b3 = linear(k3, 10, 3)
    return {"w1": w1, "b1": b1, "w2": w2, "b2": b2, "w3": w3, "b3": b3}


def mlp_reference(x, p):
    h1 = jnp.maximum(x @ p["w1"].T + p["b1"].T, 0.0)
    h2 = jnp.maximum(h1 @ p["w2"].T + p["b2"].T, 0.0)
    return h2 @ p["w3"].T + p["b3"].T


if __name__ == "__main__":
    key = jax.random.PRNGKey(0)
    kp, kx = jax.random.split(key)

    params = init_params(kp)

    # Small-batch case (matches the PyTorch usage: x of shape (B, 4)).
    x = jax.random.normal(kx, (8, 4), dtype=jnp.float32)
    out = jax.block_until_ready(mlp_forward(x, params))
    ref = mlp_reference(x, params)
    assert out.shape == (8, 3), out.shape
    assert jnp.allclose(out, ref, atol=1e-4, rtol=1e-4), "mismatch vs reference (B=8)"

    # Exercise the multi-step batch grid + padding path as well.
    x2 = jax.random.normal(jax.random.PRNGKey(1), (300, 4), dtype=jnp.float32)
    out2 = jax.block_until_ready(mlp_forward(x2, params, block_b=128))
    ref2 = mlp_reference(x2, params)
    assert out2.shape == (300, 3), out2.shape
    assert jnp.allclose(out2, ref2, atol=1e-4, rtol=1e-4), "mismatch vs reference (B=300)"

    print("KERNEL_OK")
</pallas_src>

<mosaic_0001>
module attributes {stable_mosaic.version = 11 : i64} {
  func.func @mlp_kernel(%arg0: i32, %arg1: memref<4x128xf32, #tpu.memory_space<vmem>>, %arg2: memref<10x4xf32, #tpu.memory_space<vmem>>, %arg3: memref<10x1xf32, #tpu.memory_space<vmem>>, %arg4: memref<10x10xf32, #tpu.memory_space<vmem>>, %arg5: memref<10x1xf32, #tpu.memory_space<vmem>>, %arg6: memref<3x10xf32, #tpu.memory_space<vmem>>, %arg7: memref<3x1xf32, #tpu.memory_space<vmem>>, %arg8: memref<3x128xf32, #tpu.memory_space<vmem>>) attributes {dimension_semantics = [#tpu.dimension_semantics<parallel>], iteration_bounds = array<i64: 1>, scalar_prefetch = 0 : i64, scratch_operands = 0 : i64, tpu.core_type = #tpu.core_type<tc>, window_params = [{transform_indices = @transform_0, window_bounds = array<i64: 4, 128>}, {pipeline_mode = #tpu.pipeline_mode<synchronous>, transform_indices = @transform_1, window_bounds = array<i64: 10, 4>}, {pipeline_mode = #tpu.pipeline_mode<synchronous>, transform_indices = @transform_2, window_bounds = array<i64: 10, 1>}, {pipeline_mode = #tpu.pipeline_mode<synchronous>, transform_indices = @transform_3, window_bounds = array<i64: 10, 10>}, {pipeline_mode = #tpu.pipeline_mode<synchronous>, transform_indices = @transform_4, window_bounds = array<i64: 10, 1>}, {pipeline_mode = #tpu.pipeline_mode<synchronous>, transform_indices = @transform_5, window_bounds = array<i64: 3, 10>}, {pipeline_mode = #tpu.pipeline_mode<synchronous>, transform_indices = @transform_6, window_bounds = array<i64: 3, 1>}, {transform_indices = @transform_7, window_bounds = array<i64: 3, 128>}]} {
    %c0 = arith.constant 0 : index
    %c0_0 = arith.constant 0 : index
    %0 = vector.load %arg1[%c0, %c0_0] : memref<4x128xf32, #tpu.memory_space<vmem>>, vector<4x128xf32>
    %c0_1 = arith.constant 0 : index
    %c0_2 = arith.constant 0 : index
    %1 = vector.load %arg2[%c0_1, %c0_2] : memref<10x4xf32, #tpu.memory_space<vmem>>, vector<10x4xf32>
    %cst = arith.constant dense<0.000000e+00> : vector<10x128xf32>
    %2 = tpu.matmul %1, %0, %cst {dimension_numbers = #tpu.dot_dimension_numbers<[1], [0], [0], [1], [0, 0, 1, 1], [], []>} : vector<10x4xf32>, vector<4x128xf32>, vector<10x128xf32> -> vector<10x128xf32>
    %c0_3 = arith.constant 0 : index
    %c0_4 = arith.constant 0 : index
    %3 = vector.load %arg3[%c0_3, %c0_4] : memref<10x1xf32, #tpu.memory_space<vmem>>, vector<10x1xf32>
    %4 = vector.broadcast %3 : vector<10x1xf32> to vector<10x128xf32>
    %5 = arith.addf %2, %4 : vector<10x128xf32>
    %cst_5 = arith.constant 0.000000e+00 : f32
    %6 = vector.broadcast %cst_5 : f32 to vector<10x128xf32>
    %7 = arith.maximumf %5, %6 : vector<10x128xf32>
    %c0_6 = arith.constant 0 : index
    %c0_7 = arith.constant 0 : index
    %8 = vector.load %arg4[%c0_6, %c0_7] : memref<10x10xf32, #tpu.memory_space<vmem>>, vector<10x10xf32>
    %cst_8 = arith.constant dense<0.000000e+00> : vector<10x128xf32>
    %9 = tpu.matmul %8, %7, %cst_8 {dimension_numbers = #tpu.dot_dimension_numbers<[1], [0], [0], [1], [0, 0, 1, 1], [], []>} : vector<10x10xf32>, vector<10x128xf32>, vector<10x128xf32> -> vector<10x128xf32>
    %c0_9 = arith.constant 0 : index
    %c0_10 = arith.constant 0 : index
    %10 = vector.load %arg5[%c0_9, %c0_10] : memref<10x1xf32, #tpu.memory_space<vmem>>, vector<10x1xf32>
    %11 = vector.broadcast %10 : vector<10x1xf32> to vector<10x128xf32>
    %12 = arith.addf %9, %11 : vector<10x128xf32>
    %cst_11 = arith.constant 0.000000e+00 : f32
    %13 = vector.broadcast %cst_11 : f32 to vector<10x128xf32>
    %14 = arith.maximumf %12, %13 : vector<10x128xf32>
    %c0_12 = arith.constant 0 : index
    %c0_13 = arith.constant 0 : index
    %15 = vector.load %arg6[%c0_12, %c0_13] : memref<3x10xf32, #tpu.memory_space<vmem>>, vector<3x10xf32>
    %cst_14 = arith.constant dense<0.000000e+00> : vector<3x128xf32>
    %16 = tpu.matmul %15, %14, %cst_14 {dimension_numbers = #tpu.dot_dimension_numbers<[1], [0], [0], [1], [0, 0, 1, 1], [], []>} : vector<3x10xf32>, vector<10x128xf32>, vector<3x128xf32> -> vector<3x128xf32>
    %c0_15 = arith.constant 0 : index
    %c0_16 = arith.constant 0 : index
    %17 = vector.load %arg7[%c0_15, %c0_16] : memref<3x1xf32, #tpu.memory_space<vmem>>, vector<3x1xf32>
    %18 = vector.broadcast %17 : vector<3x1xf32> to vector<3x128xf32>
    %19 = arith.addf %16, %18 : vector<3x128xf32>
    %c0_17 = arith.constant 0 : index
    %c0_18 = arith.constant 0 : index
    %20 = vector.load %arg8[%c0_17, %c0_18] : memref<3x128xf32, #tpu.memory_space<vmem>>, vector<3x128xf32>
    tpu.vector_store %arg8[%c0_17, %c0_18], %19 {strides = array<i32>} : memref<3x128xf32, #tpu.memory_space<vmem>>, vector<3x128xf32>,
    return
  }
  func.func @transform_0(%arg0: i32) -> (i32, i32) {
    %c0_i32 = arith.constant 0 : i32
    %c0_i32_0 = arith.constant 0 : i32
    return %c0_i32, %arg0 : i32, i32
  }
  func.func @transform_1(%arg0: i32) -> (i32, i32) {
    %c0_i32 = arith.constant 0 : i32
    %c0_i32_0 = arith.constant 0 : i32
    %c0_i32_1 = arith.constant 0 : i32
    return %c0_i32, %c0_i32_0 : i32, i32
  }
  func.func @transform_2(%arg0: i32) -> (i32, i32) {
    %c0_i32 = arith.constant 0 : i32
    %c0_i32_0 = arith.constant 0 : i32
    %c0_i32_1 = arith.constant 0 : i32
    return %c0_i32, %c0_i32_0 : i32, i32
  }
  func.func @transform_3(%arg0: i32) -> (i32, i32) {
    %c0_i32 = arith.constant 0 : i32
    %c0_i32_0 = arith.constant 0 : i32
    %c0_i32_1 = arith.constant 0 : i32
    return %c0_i32, %c0_i32_0 : i32, i32
  }
  func.func @transform_4(%arg0: i32) -> (i32, i32) {
    %c0_i32 = arith.constant 0 : i32
    %c0_i32_0 = arith.constant 0 : i32
    %c0_i32_1 = arith.constant 0 : i32
    return %c0_i32, %c0_i32_0 : i32, i32
  }
  func.func @transform_5(%arg0: i32) -> (i32, i32) {
    %c0_i32 = arith.constant 0 : i32
    %c0_i32_0 = arith.constant 0 : i32
    %c0_i32_1 = arith.constant 0 : i32
    return %c0_i32, %c0_i32_0 : i32, i32
  }
  func.func @transform_6(%arg0: i32) -> (i32, i32) {
    %c0_i32 = arith.constant 0 : i32
    %c0_i32_0 = arith.constant 0 : i32
    %c0_i32_1 = arith.constant 0 : i32
    return %c0_i32, %c0_i32_0 : i32, i32
  }
  func.func @transform_7(%arg0: i32) -> (i32, i32) {
    %c0_i32 = arith.constant 0 : i32
    %c0_i32_0 = arith.constant 0 : i32
    return %c0_i32, %arg0 : i32, i32
  }
}

</mosaic_0001>

<bundles_post_ra>
// kernel: tpu_custom_call.1
= control target key start
LH: loop header
LB: loop body
LE: loop exit
PB: predicated region body
PF: predicated region fallthrough
CT: control target
= control target key end

     0   :  { %vm49_vm0 = vcmask 1043456   ;;  %vm42_vm1 = vcmask 31744   ;;  %v219_v2 = vmov 0   ;;  %s303_s0 = inlined_call_operand.vmem [shape: f32[4,128], index: 0, kind: input, shape index: {}]   ;;  %s304_s1 = inlined_call_operand.vmem [shape: f32[10,4], index: 1, kind: input, shape index: {}]   ;;  %s305_s2 = inlined_call_operand.vmem [shape: f32[10,1], index: 2, kind: input, shape index: {}]   ;;  %s306_s3 = inlined_call_operand.vmem [shape: f32[10,10], index: 3, kind: input, shape index: {}]   ;;  %s307_s4 = inlined_call_operand.vmem [shape: f32[10,1], index: 4, kind: input, shape index: {}]   ;;  %s308_s5 = inlined_call_operand.vmem [shape: f32[3,10], index: 5, kind: input, shape index: {}]   ;;  %s309_s6 = inlined_call_operand.vmem [shape: f32[3,1], index: 6, kind: input, shape index: {}]   ;;  %s310_s7 = inlined_call_operand.hbm [shape: f32[3,128], index: 7, kind: output, shape index: {}]  }
   0x1   :  { %v27_v0 = vld [vmem:[%s303_s0] sm:$0xf]  ;;  %190 = vset.pattern.permute.xlu0 %v219_v2  ;;  %v31_v3 = vld [vmem:[%s305_s2 + $0x8] sm:$0x3] }
   0x2   :  { %v28_v1 = vld [vmem:[%s304_s1] sm:$0xff]  ;;  %178 = vmatpush.msk.msra.mxu0 %vm49_vm0, %v27_v0  ;;  %39 = vperm.xlu0 %190, %v31_v3  }
   0x3   :  { %179 = vmatmul.msk.f32.vlgmr.msra.gmra.mxu0 %vm42_vm1, %v28_v1 }
   0x4   :  { %12 = vsyncpa [#allocation3], 0  ;;  %191 = vset.pattern.permute.xlu1 %v219_v2  ;;  %192 = vset.pattern.permute.xlu2 %v219_v2  ;;  %v29_v4 = vld [vmem:[%s304_s1 + $0x8] sm:$0x3]  ;;  %v30_v5 = vld [vmem:[%s305_s2] sm:$0xff]  ;;  %vm99_vm2 = vcmask 1041408  }
   0x5   :  { %v81_v6 = vld [vmem:[%s307_s4 + $0x8] sm:$0x3]  ;;  %v80_v7 = vld [vmem:[%s307_s4] sm:$0xff]  ;;  %vm92_vm3 = vcmask 80896   ;;  %s169_s21 = sshll.u32 %s310_s7, 4  ;;  %s170_s21 = int_to_ptr.hbm [resolvable:$true] %s169_s21 }
   0x6   :  { %89 = vperm.xlu1 %191, %v81_v6   ;;  %v78_v16 = vld [vmem:[%s306_s3] sm:$0xff]  ;;  %v79_v17 = vld [vmem:[%s306_s3 + $0x8] sm:$0x3] }
   0x7   :  { %v129_v18 = vld [vmem:[%s309_s6] sm:$0x7]  ;;  %s220_s6 = smov [#allocation2]  }
   0x8   :  { %132 = vperm.xlu2 %192, %v129_v18   ;;  %v128_v27 = vld [vmem:[%s308_s5] sm:$0x7]  ;;  %s167_s18 = sshll.u32 %s220_s6, 4  ;;  %s168_s18 = int_to_ptr.vmem [resolvable:$true] %s167_s18 }
   0xa   :  { %34 = vperm.xlu0 %190, %v30_v5  }
   0xb   :  { %180 = vmatmul.msk.f32.gmra.mxu0 %vm42_vm1, %v29_v4 }
   0xe   :  { %84 = vperm.xlu1 %191, %v80_v7  }
  0x62   :  { %v133_v28 = vpop.permute.xlu2 %132 }
  0x74   :  { %v40_v8 = vpop.permute.xlu0 %39 }
  0x78   :  { %v90_v19 = vpop.permute.xlu1 %89 }
  0x7c   :  { %v35_v10 = vpop.permute.xlu0 %34 }
  0x80   :  { %v70_v9 = vpop.f32.mrf.mxu0  ;;  %v85_v20 = vpop.permute.xlu1 %84 }
  0x81   :  { %v71_v12 = vadd.f32 %v70_v9, %v35_v10 }
  0x83   :  { %v76_v15 = vmax.f32 %v71_v12, 0.0 }
  0x88   :  { %v73_v11 = vpop.f32.mrf.mxu0 }
  0x89   :  { %v74_v13 = vadd.f32 %v73_v11, %v40_v8 }
  0x8b   :  { %v77_v14 = vmax.f32 %v74_v13, 0.0 }
  0x8d   :  { %181 = vmatpush.msk.msra.mxu1 %vm99_vm2, %v77_v14  ;;  %186 = vmatpush.msk.msra.mxu3 %vm99_vm2, %v77_v14 }
  0x8f   :  { %118 = vmatpush.msra.mxu1 %v76_v15  ;;  %187 = vmatpush.msra.mxu3 %v76_v15 }
  0x90   :  { %182 = vmatmul.msk.f32.vlgmr.msra.gmra.mxu1 %vm92_vm3, %v78_v16  ;;  %183 = vmatmul.msk.f32.vlgmr.msra.gmra.mxu3 %vm92_vm3, %v79_v17 }
 0x10d   :  { %v120_v21 = vpop.f32.mrf.mxu1 }
 0x10e   :  { %v121_v23 = vadd.f32 %v120_v21, %v85_v20 }
 0x110   :  { %v126_v26 = vmax.f32 %v121_v23, 0.0 }
 0x113   :  { %v123_v22 = vpop.f32.mrf.mxu3 }
 0x114   :  { %v124_v24 = vadd.f32 %v123_v22, %v90_v19 }
 0x116   :  { %v127_v25 = vmax.f32 %v124_v24, 0.0 }
 0x118   :  { %184 = vmatpush.msk.msra.mxu2 %vm99_vm2, %v127_v25 }
 0x11a   :  { %156 = vmatpush.msra.mxu2 %v126_v26 }
 0x11b   :  { %185 = vmatmul.msk.f32.vlgmr.msra.gmra.mxu2 %vm92_vm3, %v128_v27 }
 0x19e   :  { %v158_v29 = vpop.f32.mrf.mxu2 }
 0x19f   :  { %v159_v30 = vadd.f32 %v158_v29, %v133_v28 }
 0x1a1   :  { %161 = vst [vmem:[#allocation2] sm:$0x7] %v159_v30 }
 0x1a2   :  { %172 = dma.vmem_to_hbm [thread:$0]  %s168_s18, 64, %s170_s21, [#allocation3]  }
 0x1a3   :  { %217 = dma.done.wait [#allocation3], 64  }
 0x1a4   :  { %218 = vsyncadd [#allocation3], 4294967232 }
 0x1a5   :  { %177 = vsyncpa [#allocation3], 1 }

</bundles_post_ra>
